<compile_context>
chip_gen: v7x
topology: tpu7x:2x2x1
jax: 0.10.0
libtpu: 0.0.40
codegen_flags: <defaults>
</compile_context>

<pallas_src>
import functools

import jax
import jax.numpy as jnp
import numpy as np
from jax import lax
from jax.experimental import pallas as pl
from jax.experimental.pallas import tpu as pltpu

EPS = 1e-5
# <= v7x's 64 MiB per-TC VMEM; tiles below use only a few MiB, so the same limit is
# also safe (if conservative) on v5e/v6e's 128 MiB.
VMEM_LIMIT = 48 * 1024 * 1024


def _round_up(a, b):
    return (a + b - 1) // b * b


def _vmem_specs(n):
    return [pl.BlockSpec(memory_space=pltpu.MemorySpace.VMEM) for _ in range(n)]


def _tiles(s, k, cout):
    """Tile sizes: lane-dense (multiple-of-128) channel/K tiles, 16-aligned rows."""
    ts = min(512, _round_up(s, 16))
    s_pad = _round_up(s, ts)
    k128 = _round_up(k, 128)
    tk = k128 if k128 <= 1024 else 512
    k_pad = _round_up(k128, tk)
    # Cout tile as wide as VMEM comfortably allows so patch tiles are read once
    # per K tile (c_pad // tn == 1 for typical ResNet channel counts).
    tn = min(512, _round_up(cout, 128))
    c_pad = _round_up(cout, tn)
    return ts, s_pad, tk, k_pad, tn, c_pad


# ---------------------------------------------------------------------------
# Kernel 1: tiled conv-as-matmul + folded BatchNorm (+ optional ReLU)
#           + (optionally) fused SE pooled-sum accumulation in the epilogue.
#   grid = (batch, Cout tiles, spatial tiles, K tiles); K is the reduction axis;
#   the pooled-sum output block (b, 0, j) is resident across the two inner axes.
# ---------------------------------------------------------------------------
def _conv_bn_kernel(*refs, relu, pool, single_k, s_true, ts):
    if pool:
        if single_k:
            p_ref, w_ref, shift_ref, o_ref, sum_ref = refs
            acc_ref = None
        else:
            p_ref, w_ref, shift_ref, o_ref, sum_ref, acc_ref = refs
    else:
        if single_k:
            p_ref, w_ref, shift_ref, o_ref = refs
            acc_ref = None
        else:
            p_ref, w_ref, shift_ref, o_ref, acc_ref = refs

    si = pl.program_id(2)
    kk = pl.program_id(3)

    def epilogue(acc):
        # BN scale already folded into the weights; only shift (+ReLU) here.
        y = acc + shift_ref[...]
        if relu:
            y = jnp.maximum(y, 0.0)
        o_ref[0] = y.astype(o_ref.dtype)
        if pool:
            @pl.when(si == 0)
            def _():
                sum_ref[...] = jnp.zeros_like(sum_ref)
            # mask padded spatial rows (they equal `shift` after the epilogue)
            row = si * ts + lax.broadcasted_iota(jnp.int32, y.shape, 0)
            ym = jnp.where(row < s_true, y, 0.0)
            sum_ref[...] += jnp.sum(ym, axis=0, keepdims=True)[None]

    if single_k:
        # K fits in one tile: no f32 scratch accumulator needed at all.
        epilogue(jnp.dot(p_ref[0], w_ref[...], preferred_element_type=jnp.float32))
    else:
        @pl.when(kk == 0)
        def _():
            acc_ref[...] = jnp.zeros_like(acc_ref)

        acc_ref[...] += jnp.dot(p_ref[0], w_ref[...],
                                preferred_element_type=jnp.float32)

        @pl.when(kk == pl.num_programs(3) - 1)
        def _():
            epilogue(acc_ref[...])


# ---------------------------------------------------------------------------
# Kernel 2: SE fc1+ReLU / fc2+sigmoid on the tiny (N, C) pooled vector (bf16 MXU)
# ---------------------------------------------------------------------------
def _se_fc_kernel(sum_ref, f1w_ref, f1b_ref, f2w_ref, f2b_ref, gate_ref, *, inv_s, ch):
    pooled = (sum_ref[...][:, 0, :] * inv_s).astype(jnp.bfloat16)        # (N, Cp)
    z = jnp.dot(pooled, f1w_ref[...], preferred_element_type=jnp.float32) + f1b_ref[...]
    z = jnp.maximum(z, 0.0).astype(jnp.bfloat16)
    g = jnp.dot(z, f2w_ref[...], preferred_element_type=jnp.float32) + f2b_ref[...]
    g = jax.nn.sigmoid(g)
    # mask padded channels explicitly (don't rely on zero-padded h2 invariant)
    col = lax.broadcasted_iota(jnp.int32, g.shape, 1)
    g = jnp.where(col < ch, g, 0.0)
    gate_ref[...] = g[:, None, :]


# ---------------------------------------------------------------------------
# Kernel 3: streamed elementwise  gate*h + shortcut + ReLU
#   (i)  conv-shortcut variant: 1x1 conv (+ folded BN) of x fused per tile
#   (ii) identity-shortcut variant
# ---------------------------------------------------------------------------
def _se_add_convsc_kernel(h_ref, gate_ref, xs_ref, scw_ref, shift_ref, o_ref):
    sc = jnp.dot(xs_ref[0], scw_ref[...], preferred_element_type=jnp.float32)
    sc = sc + shift_ref[...]
    out = gate_ref[...] * h_ref[...].astype(jnp.float32) + sc[None]
    o_ref[...] = jnp.maximum(out, 0.0).astype(o_ref.dtype)


def _se_add_id_kernel(h_ref, gate_ref, sc_ref, o_ref):
    out = gate_ref[...] * h_ref[...].astype(jnp.float32) + sc_ref[...].astype(jnp.float32)
    o_ref[...] = jnp.maximum(out, 0.0).astype(o_ref.dtype)


# ---------------------------------------------------------------------------
# Glue: im2col ("same" padding = k//2 per side, stride) — reshapes/padding only
# ---------------------------------------------------------------------------
def _im2col(x, k, stride):
    pad = k // 2
    xpad = jnp.pad(x, ((0, 0), (pad, pad), (pad, pad), (0, 0)))
    n, hp, wp, c = xpad.shape
    ho = (hp - k) // stride + 1
    wo = (wp - k) // stride + 1
    cols = []
    for i in range(k):
        for j in range(k):
            cols.append(
                xpad[:, i:i + (ho - 1) * stride + 1:stride,
                        j:j + (wo - 1) * stride + 1:stride, :]
            )
    p = jnp.stack(cols, axis=3)                         # (n, ho, wo, k*k, c)
    return p.reshape(n, ho * wo, k * k * c), ho, wo


def conv_bn_padded(x, w, gamma, beta, mean, var, stride, relu, pool):
    """conv+BN(+ReLU) in padded (N, S_pad, C_pad) bf16 layout.

    If pool=True also returns the spatial column sums (N, 1, C_pad) f32 computed
    in the conv epilogue (pad rows masked).
    """
    k = w.shape[0]
    cin, cout = w.shape[2], w.shape[3]
    n = x.shape[0]

    patches, ho, wo = _im2col(x.astype(jnp.bfloat16), k, stride)   # (N, S, K) bf16
    s_true = ho * wo
    kdim = k * k * cin
    ts, s_pad, tk, k_pad, tn, c_pad = _tiles(s_true, kdim, cout)
    single_k = (k_pad // tk) == 1

    patches = jnp.pad(patches, ((0, 0), (0, s_pad - s_true), (0, k_pad - kdim)))
    inv = (gamma / jnp.sqrt(var + EPS)).astype(jnp.float32)
    # Fold the BN scale into the weights in f32 BEFORE the bf16 cast.
    wmat = (w.reshape(kdim, cout).astype(jnp.float32) * inv[None, :]).astype(jnp.bfloat16)
    wmat = jnp.pad(wmat, ((0, k_pad - kdim), (0, c_pad - cout)))
    shift = jnp.pad(beta - mean * inv, (0, c_pad - cout)).reshape(1, c_pad).astype(jnp.float32)

    grid = (n, c_pad // tn, s_pad // ts, k_pad // tk)
    in_specs = [
        pl.BlockSpec((1, ts, tk), lambda b, j, s, kk: (b, s, kk)),
        pl.BlockSpec((tk, tn), lambda b, j, s, kk: (kk, j)),
        pl.BlockSpec((1, tn), lambda b, j, s, kk: (0, j)),
    ]
    h_shape = jax.ShapeDtypeStruct((n, s_pad, c_pad), jnp.bfloat16)
    h_spec = pl.BlockSpec((1, ts, tn), lambda b, j, s, kk: (b, s, j))
    if pool:
        out_shape = (h_shape, jax.ShapeDtypeStruct((n, 1, c_pad), jnp.float32))
        out_specs = (h_spec, pl.BlockSpec((1, 1, tn), lambda b, j, s, kk: (b, 0, j)))
        # spatial axis carries the pooled-sum accumulator -> must be "arbitrary"
        sem = ("parallel", "parallel", "arbitrary", "arbitrary")
    else:
        out_shape = h_shape
        out_specs = h_spec
        sem = ("parallel", "parallel", "parallel", "arbitrary")

    scratch = [] if single_k else [pltpu.VMEM((ts, tn), jnp.float32)]

    res = pl.pallas_call(
        functools.partial(_conv_bn_kernel, relu=relu, pool=pool,
                          single_k=single_k, s_true=s_true, ts=ts),
        out_shape=out_shape,
        grid_spec=pltpu.PrefetchScalarGridSpec(
            num_scalar_prefetch=0,
            grid=grid,
            in_specs=in_specs,
            out_specs=out_specs,
            scratch_shapes=scratch),
        compiler_params=pltpu.CompilerParams(
            dimension_semantics=sem,
            vmem_limit_bytes=VMEM_LIMIT),
    )(patches, wmat, shift)

    meta = (ho, wo, cout, s_true, ts, s_pad, c_pad)
    if pool:
        return res[0], res[1], meta
    return res, meta


# ---------------------------------------------------------------------------
# BasicBlock forward
# ---------------------------------------------------------------------------
def basic_block_forward(x, p, stride):
    n, hin, win, cin = x.shape
    ch = p["conv1_w"].shape[3]

    # h = relu(bn1(conv1(x)))      -- bf16 padded output
    h1_pad, meta1 = conv_bn_padded(x, p["conv1_w"], p["bn1_g"], p["bn1_b"],
                                   p["bn1_m"], p["bn1_v"], stride,
                                   relu=True, pool=False)
    ho, wo, _, s1, _, _, _ = meta1
    h1 = h1_pad[:, :s1, :ch].reshape(n, ho, wo, ch)       # stays bf16

    # h = bn2(conv2(h))            -- bf16 padded output + fused SE pooled sums
    h2_pad, pooled_sum, meta2 = conv_bn_padded(h1, p["conv2_w"], p["bn2_g"],
                                               p["bn2_b"], p["bn2_m"], p["bn2_v"],
                                               1, relu=False, pool=True)
    ho2, wo2, _, s_true, ts, s_pad, c_pad = meta2
    assert (ho2, wo2) == (ho, wo)

    # --- SE: fc1 + ReLU, fc2 + sigmoid (tiny, bf16 MXU, gate masked on pad channels)
    cr = p["fc1_w"].shape[1]
    cr_pad = _round_up(max(cr, 1), 128)
    f1w = jnp.pad(p["fc1_w"], ((0, c_pad - ch), (0, cr_pad - cr))).astype(jnp.bfloat16)
    f1b = jnp.pad(p["fc1_b"], (0, cr_pad - cr)).reshape(1, cr_pad).astype(jnp.float32)
    f2w = jnp.pad(p["fc2_w"], ((0, cr_pad - cr), (0, c_pad - ch))).astype(jnp.bfloat16)
    f2b = jnp.pad(p["fc2_b"], (0, c_pad - ch)).reshape(1, c_pad).astype(jnp.float32)
    gate = pl.pallas_call(
        functools.partial(_se_fc_kernel, inv_s=1.0 / float(s_true), ch=ch),
        out_shape=jax.ShapeDtypeStruct((n, 1, c_pad), jnp.float32),
        in_specs=_vmem_specs(5),
        out_specs=pl.BlockSpec(memory_space=pltpu.MemorySpace.VMEM),
        compiler_params=pltpu.CompilerParams(vmem_limit_bytes=VMEM_LIMIT),
    )(pooled_sum, f1w, f1b, f2w, f2b)

    # --- final pass: gate*h + shortcut + ReLU (1x1 shortcut conv + BN fused) ---
    if stride != 1 or cin != ch:
        cin_pad = _round_up(cin, 128)
        xs = x[:, ::stride, ::stride, :].reshape(n, s_true, cin)
        xs = jnp.pad(xs.astype(jnp.bfloat16),
                     ((0, 0), (0, s_pad - s_true), (0, cin_pad - cin)))
        inv = p["scbn_g"] / jnp.sqrt(p["scbn_v"] + EPS)
        scw = (p["sc_w"].reshape(cin, ch).astype(jnp.float32) * inv[None, :]).astype(jnp.bfloat16)
        scw = jnp.pad(scw, ((0, cin_pad - cin), (0, c_pad - ch)))
        sc_shift = jnp.pad(p["scbn_b"] - p["scbn_m"] * inv,
                           (0, c_pad - ch)).reshape(1, c_pad).astype(jnp.float32)
        out_pad = pl.pallas_call(
            _se_add_convsc_kernel,
            out_shape=jax.ShapeDtypeStruct((n, s_pad, c_pad), jnp.bfloat16),
            grid_spec=pltpu.PrefetchScalarGridSpec(
                num_scalar_prefetch=0,
                grid=(n, s_pad // ts),
                in_specs=[
                    pl.BlockSpec((1, ts, c_pad), lambda b, si: (b, si, 0)),
                    pl.BlockSpec((1, 1, c_pad), lambda b, si: (b, 0, 0)),
                    pl.BlockSpec((1, ts, cin_pad), lambda b, si: (b, si, 0)),
                    pl.BlockSpec((cin_pad, c_pad), lambda b, si: (0, 0)),
                    pl.BlockSpec((1, c_pad), lambda b, si: (0, 0)),
                ],
                out_specs=pl.BlockSpec((1, ts, c_pad), lambda b, si: (b, si, 0)),
            ),
            compiler_params=pltpu.CompilerParams(
                dimension_semantics=("parallel", "parallel"),
                vmem_limit_bytes=VMEM_LIMIT),
        )(h2_pad, gate, xs, scw, sc_shift)
    else:
        sc = x.reshape(n, s_true, cin).astype(jnp.bfloat16)
        sc = jnp.pad(sc, ((0, 0), (0, s_pad - s_true), (0, c_pad - cin)))
        out_pad = pl.pallas_call(
            _se_add_id_kernel,
            out_shape=jax.ShapeDtypeStruct((n, s_pad, c_pad), jnp.bfloat16),
            grid_spec=pltpu.PrefetchScalarGridSpec(
                num_scalar_prefetch=0,
                grid=(n, s_pad // ts),
                in_specs=[
                    pl.BlockSpec((1, ts, c_pad), lambda b, si: (b, si, 0)),
                    pl.BlockSpec((1, 1, c_pad), lambda b, si: (b, 0, 0)),
                    pl.BlockSpec((1, ts, c_pad), lambda b, si: (b, si, 0)),
                ],
                out_specs=pl.BlockSpec((1, ts, c_pad), lambda b, si: (b, si, 0)),
            ),
            compiler_params=pltpu.CompilerParams(
                dimension_semantics=("parallel", "parallel"),
                vmem_limit_bytes=VMEM_LIMIT),
        )(h2_pad, gate, sc)

    return out_pad[:, :s_true, :ch].reshape(n, ho, wo, ch).astype(jnp.float32)


# ---------------------------------------------------------------------------
# Deterministic synthetic parameters (BN in inference mode)
# ---------------------------------------------------------------------------
def init_params(key, in_ch, ch, reduction=4):
    cr = max(ch // reduction, 1)
    ks = jax.random.split(key, 10)

    def nrm(k, shp, s=0.1):
        return (s * jax.random.normal(k, shp)).astype(jnp.float32)

    def bn(k):
        k1, k2, k3, k4 = jax.random.split(k, 4)
        return (
            (1.0 + 0.1 * jax.random.normal(k1, (ch,))).astype(jnp.float32),  # gamma
            (0.1 * jax.random.normal(k2, (ch,))).astype(jnp.float32),        # beta
            (0.05 * jax.random.normal(k3, (ch,))).astype(jnp.float32),       # running mean
            (1.0 + 0.1 * jnp.abs(jax.random.normal(k4, (ch,)))).astype(jnp.float32),  # var
        )

    bn1, bn2, scbn = bn(ks[1]), bn(ks[3]), bn(ks[5])
    return dict(
        conv1_w=nrm(ks[0], (3, 3, in_ch, ch)),
        bn1_g=bn1[0], bn1_b=bn1[1], bn1_m=bn1[2], bn1_v=bn1[3],
        conv2_w=nrm(ks[2], (3, 3, ch, ch)),
        bn2_g=bn2[0], bn2_b=bn2[1], bn2_m=bn2[2], bn2_v=bn2[3],
        sc_w=nrm(ks[4], (1, 1, in_ch, ch)),
        scbn_g=scbn[0], scbn_b=scbn[1], scbn_m=scbn[2], scbn_v=scbn[3],
        fc1_w=nrm(ks[6], (ch, cr)), fc1_b=nrm(ks[7], (cr,)),
        fc2_w=nrm(ks[8], (cr, ch)), fc2_b=nrm(ks[9], (ch,)),
    )


# ---------------------------------------------------------------------------
# Pure-JAX reference (mirrors bf16 MXU inputs, f32 accumulation/epilogue)
# ---------------------------------------------------------------------------
def ref_forward(x, p, stride):
    def conv(x, w, s, pad):
        return lax.conv_general_dilated(
            x.astype(jnp.bfloat16), w.astype(jnp.bfloat16), (s, s),
            [(pad, pad), (pad, pad)],
            dimension_numbers=("NHWC", "HWIO", "NHWC"),
            preferred_element_type=jnp.float32)

    def bn(x, g, b, m, v):
        return (x - m) / jnp.sqrt(v + EPS) * g + b

    h = jax.nn.relu(bn(conv(x, p["conv1_w"], stride, 1),
                       p["bn1_g"], p["bn1_b"], p["bn1_m"], p["bn1_v"]))
    h = bn(conv(h, p["conv2_w"], 1, 1),
           p["bn2_g"], p["bn2_b"], p["bn2_m"], p["bn2_v"])
    w = jnp.mean(h, axis=(1, 2), keepdims=True)
    w = jax.nn.relu(jnp.einsum("nhwc,cd->nhwd", w, p["fc1_w"]) + p["fc1_b"])
    w = jax.nn.sigmoid(jnp.einsum("nhwc,cd->nhwd", w, p["fc2_w"]) + p["fc2_b"])
    h = w * h
    if stride != 1 or x.shape[-1] != h.shape[-1]:
        sc = bn(conv(x, p["sc_w"], stride, 0),
                p["scbn_g"], p["scbn_b"], p["scbn_m"], p["scbn_v"])
    else:
        sc = x
    return jax.nn.relu(h + sc)


if __name__ == "__main__":
    key = jax.random.PRNGKey(0)
    kx, kp = jax.random.split(key)

    N, H, W, CIN, CH, STRIDE = 2, 16, 16, 4, 8, 2
    x = jax.random.normal(kx, (N, H, W, CIN), dtype=jnp.float32)
    params = init_params(kp, CIN, CH)

    fwd = jax.jit(basic_block_forward, static_argnums=2)
    out = jax.block_until_ready(fwd(x, params, STRIDE))

    assert out.shape == (N, H // STRIDE, W // STRIDE, CH), out.shape
    ref = jax.block_until_ready(ref_forward(x, params, STRIDE))
    # tolerance accounts for bf16 MXU inputs + bf16 HBM intermediates
    np.testing.assert_allclose(np.asarray(out), np.asarray(ref), rtol=2e-2, atol=2e-2)

    print("KERNEL_OK")
</pallas_src>

<mosaic_0001>
module attributes {stable_mosaic.version = 11 : i64} {
  func.func @_conv_bn_kernel(%arg0: i32, %arg1: i32, %arg2: i32, %arg3: i32, %arg4: memref<1x64x128xbf16, #tpu.memory_space<vmem>>, %arg5: memref<128x128xbf16, #tpu.memory_space<vmem>>, %arg6: memref<1x128xf32, #tpu.memory_space<vmem>>, %arg7: memref<1x64x128xbf16, #tpu.memory_space<vmem>>) attributes {dimension_semantics = [#tpu.dimension_semantics<parallel>, #tpu.dimension_semantics<parallel>, #tpu.dimension_semantics<parallel>, #tpu.dimension_semantics<arbitrary>], iteration_bounds = array<i64: 2, 1, 1, 1>, scalar_prefetch = 0 : i64, scratch_operands = 0 : i64, tpu.core_type = #tpu.core_type<tc>, window_params = [{transform_indices = @transform_0, window_bounds = array<i64: 1, 64, 128>}, {transform_indices = @transform_1, window_bounds = array<i64: 128, 128>}, {transform_indices = @transform_2, window_bounds = array<i64: 1, 128>}, {transform_indices = @transform_3, window_bounds = array<i64: 1, 64, 128>}]} {
    %c0 = arith.constant 0 : index
    %c0_0 = arith.constant 0 : index
    %c0_1 = arith.constant 0 : index
    %0 = vector.load %arg4[%c0, %c0_0, %c0_1] : memref<1x64x128xbf16, #tpu.memory_space<vmem>>, vector<1x64x128xbf16>
    %1 = vector.shape_cast %0 : vector<1x64x128xbf16> to vector<64x128xbf16>
    %c0_2 = arith.constant 0 : index
    %c0_3 = arith.constant 0 : index
    %2 = vector.load %arg5[%c0_2, %c0_3] : memref<128x128xbf16, #tpu.memory_space<vmem>>, vector<128x128xbf16>
    %cst = arith.constant dense<0.000000e+00> : vector<64x128xf32>
    %3 = tpu.matmul %1, %2, %cst {dimension_numbers = #tpu.dot_dimension_numbers<[1], [0], [0], [1], [0, 0, 1, 1], [], []>} : vector<64x128xbf16>, vector<128x128xbf16>, vector<64x128xf32> -> vector<64x128xf32>
    %c0_4 = arith.constant 0 : index
    %c0_5 = arith.constant 0 : index
    %4 = vector.load %arg6[%c0_4, %c0_5] : memref<1x128xf32, #tpu.memory_space<vmem>>, vector<1x128xf32>
    %5 = vector.broadcast %4 : vector<1x128xf32> to vector<64x128xf32>
    %6 = arith.addf %3, %5 : vector<64x128xf32>
    %cst_6 = arith.constant 0.000000e+00 : f32
    %7 = vector.broadcast %cst_6 : f32 to vector<64x128xf32>
    %8 = arith.maximumf %6, %7 : vector<64x128xf32>
    %9 = arith.truncf %8 : vector<64x128xf32> to vector<64x128xbf16>
    %c0_7 = arith.constant 0 : index
    %c0_8 = arith.constant 0 : index
    %c0_9 = arith.constant 0 : index
    %10 = vector.load %arg7[%c0_7, %c0_8, %c0_9] : memref<1x64x128xbf16, #tpu.memory_space<vmem>>, vector<1x64x128xbf16>
    %11 = vector.shape_cast %10 : vector<1x64x128xbf16> to vector<64x128xbf16>
    %12 = vector.shape_cast %9 : vector<64x128xbf16> to vector<1x64x128xbf16>
    tpu.vector_store %arg7[%c0_7, %c0_8, %c0_9], %12 {strides = array<i32>} : memref<1x64x128xbf16, #tpu.memory_space<vmem>>, vector<1x64x128xbf16>,
    return
  }
  func.func @transform_0(%arg0: i32, %arg1: i32, %arg2: i32, %arg3: i32) -> (i32, i32, i32) {
    %c0_i32 = arith.constant 0 : i32
    return %arg0, %arg2, %arg3 : i32, i32, i32
  }
  func.func @transform_1(%arg0: i32, %arg1: i32, %arg2: i32, %arg3: i32) -> (i32, i32) {
    %c0_i32 = arith.constant 0 : i32
    return %arg3, %arg1 : i32, i32
  }
  func.func @transform_2(%arg0: i32, %arg1: i32, %arg2: i32, %arg3: i32) -> (i32, i32) {
    %c0_i32 = arith.constant 0 : i32
    %c0_i32_0 = arith.constant 0 : i32
    return %c0_i32, %arg1 : i32, i32
  }
  func.func @transform_3(%arg0: i32, %arg1: i32, %arg2: i32, %arg3: i32) -> (i32, i32, i32) {
    %c0_i32 = arith.constant 0 : i32
    return %arg0, %arg2, %arg1 : i32, i32, i32
  }
}

module attributes {stable_mosaic.version = 11 : i64} {
  func.func @_conv_bn_kernel(%arg0: i32, %arg1: i32, %arg2: i32, %arg3: i32, %arg4: memref<1x64x128xbf16, #tpu.memory_space<vmem>>, %arg5: memref<128x128xbf16, #tpu.memory_space<vmem>>, %arg6: memref<1x128xf32, #tpu.memory_space<vmem>>, %arg7: memref<1x64x128xbf16, #tpu.memory_space<vmem>>, %arg8: memref<1x1x128xf32, #tpu.memory_space<vmem>>) attributes {dimension_semantics = [#tpu.dimension_semantics<parallel>, #tpu.dimension_semantics<parallel>, #tpu.dimension_semantics<arbitrary>, #tpu.dimension_semantics<arbitrary>], iteration_bounds = array<i64: 2, 1, 1, 1>, scalar_prefetch = 0 : i64, scratch_operands = 0 : i64, tpu.core_type = #tpu.core_type<tc>, window_params = [{transform_indices = @transform_0, window_bounds = array<i64: 1, 64, 128>}, {transform_indices = @transform_1, window_bounds = array<i64: 128, 128>}, {transform_indices = @transform_2, window_bounds = array<i64: 1, 128>}, {transform_indices = @transform_3, window_bounds = array<i64: 1, 64, 128>}, {transform_indices = @transform_4, window_bounds = array<i64: 1, 1, 128>}]} {
    %c0 = arith.constant 0 : index
    %c0_0 = arith.constant 0 : index
    %c0_1 = arith.constant 0 : index
    %0 = vector.load %arg4[%c0, %c0_0, %c0_1] : memref<1x64x128xbf16, #tpu.memory_space<vmem>>, vector<1x64x128xbf16>
    %1 = vector.shape_cast %0 : vector<1x64x128xbf16> to vector<64x128xbf16>
    %c0_2 = arith.constant 0 : index
    %c0_3 = arith.constant 0 : index
    %2 = vector.load %arg5[%c0_2, %c0_3] : memref<128x128xbf16, #tpu.memory_space<vmem>>, vector<128x128xbf16>
    %cst = arith.constant dense<0.000000e+00> : vector<64x128xf32>
    %3 = tpu.matmul %1, %2, %cst {dimension_numbers = #tpu.dot_dimension_numbers<[1], [0], [0], [1], [0, 0, 1, 1], [], []>} : vector<64x128xbf16>, vector<128x128xbf16>, vector<64x128xf32> -> vector<64x128xf32>
    %c0_4 = arith.constant 0 : index
    %c0_5 = arith.constant 0 : index
    %4 = vector.load %arg6[%c0_4, %c0_5] : memref<1x128xf32, #tpu.memory_space<vmem>>, vector<1x128xf32>
    %5 = vector.broadcast %4 : vector<1x128xf32> to vector<64x128xf32>
    %6 = arith.addf %3, %5 : vector<64x128xf32>
    %7 = arith.truncf %6 : vector<64x128xf32> to vector<64x128xbf16>
    %c0_6 = arith.constant 0 : index
    %c0_7 = arith.constant 0 : index
    %c0_8 = arith.constant 0 : index
    %8 = vector.load %arg7[%c0_6, %c0_7, %c0_8] : memref<1x64x128xbf16, #tpu.memory_space<vmem>>, vector<1x64x128xbf16>
    %9 = vector.shape_cast %8 : vector<1x64x128xbf16> to vector<64x128xbf16>
    %10 = vector.shape_cast %7 : vector<64x128xbf16> to vector<1x64x128xbf16>
    tpu.vector_store %arg7[%c0_6, %c0_7, %c0_8], %10 {strides = array<i32>} : memref<1x64x128xbf16, #tpu.memory_space<vmem>>, vector<1x64x128xbf16>,
    %c0_i32 = arith.constant 0 : i32
    %11 = arith.cmpi eq, %arg2, %c0_i32 : i32
    %12 = arith.extui %11 : i1 to i32
    %c0_i32_9 = arith.constant 0 : i32
    %13 = arith.cmpi ne, %12, %c0_i32_9 : i32
    scf.if %13 {
      %cst_19 = arith.constant 0.000000e+00 : f32
      %28 = vector.broadcast %cst_19 : f32 to vector<1x1x128xf32>
      %c0_20 = arith.constant 0 : index
      %c0_21 = arith.constant 0 : index
      %c0_22 = arith.constant 0 : index
      %29 = vector.load %arg8[%c0_20, %c0_21, %c0_22] : memref<1x1x128xf32, #tpu.memory_space<vmem>>, vector<1x1x128xf32>
      tpu.vector_store %arg8[%c0_20, %c0_21, %c0_22], %28 {strides = array<i32>} : memref<1x1x128xf32, #tpu.memory_space<vmem>>, vector<1x1x128xf32>,
    } else {
    }
    %c64_i32 = arith.constant 64 : i32
    %14 = arith.muli %arg2, %c64_i32 : i32
    %15 = tpu.iota {dimensions = array<i32: 0>} : vector<64x128xi32>
    %16 = vector.broadcast %14 : i32 to vector<64x128xi32>
    %17 = arith.addi %16, %15 : vector<64x128xi32>
    %c64_i32_10 = arith.constant 64 : i32
    %18 = vector.broadcast %c64_i32_10 : i32 to vector<64x128xi32>
    %19 = arith.cmpi slt, %17, %18 : vector<64x128xi32>
    %cst_11 = arith.constant 0.000000e+00 : f32
    %20 = vector.broadcast %cst_11 : f32 to vector<64x128xf32>
    %21 = arith.select %19, %6, %20 : vector<64x128xi1>, vector<64x128xf32>
    %c0_12 = arith.constant 0 : index
    %c0_13 = arith.constant 0 : index
    %c0_14 = arith.constant 0 : index
    %22 = vector.load %arg8[%c0_12, %c0_13, %c0_14] : memref<1x1x128xf32, #tpu.memory_space<vmem>>, vector<1x1x128xf32>
    %cst_15 = arith.constant dense<0.000000e+00> : vector<128xf32>
    %23 = vector.multi_reduction <add>, %21, %cst_15 [0] : vector<64x128xf32> to vector<128xf32>
    %24 = vector.shape_cast %23 : vector<128xf32> to vector<1x128xf32>
    %25 = vector.shape_cast %24 : vector<1x128xf32> to vector<1x1x128xf32>
    %26 = arith.addf %22, %25 : vector<1x1x128xf32>
    %c0_16 = arith.constant 0 : index
    %c0_17 = arith.constant 0 : index
    %c0_18 = arith.constant 0 : index
    %27 = vector.load %arg8[%c0_16, %c0_17, %c0_18] : memref<1x1x128xf32, #tpu.memory_space<vmem>>, vector<1x1x128xf32>
    tpu.vector_store %arg8[%c0_16, %c0_17, %c0_18], %26 {strides = array<i32>} : memref<1x1x128xf32, #tpu.memory_space<vmem>>, vector<1x1x128xf32>,
    return
  }
  func.func @transform_0(%arg0: i32, %arg1: i32, %arg2: i32, %arg3: i32) -> (i32, i32, i32) {
    %c0_i32 = arith.constant 0 : i32
    return %arg0, %arg2, %arg3 : i32, i32, i32
  }
  func.func @transform_1(%arg0: i32, %arg1: i32, %arg2: i32, %arg3: i32) -> (i32, i32) {
    %c0_i32 = arith.constant 0 : i32
    return %arg3, %arg1 : i32, i32
  }
  func.func @transform_2(%arg0: i32, %arg1: i32, %arg2: i32, %arg3: i32) -> (i32, i32) {
    %c0_i32 = arith.constant 0 : i32
    %c0_i32_0 = arith.constant 0 : i32
    return %c0_i32, %arg1 : i32, i32
  }
  func.func @transform_3(%arg0: i32, %arg1: i32, %arg2: i32, %arg3: i32) -> (i32, i32, i32) {
    %c0_i32 = arith.constant 0 : i32
    return %arg0, %arg2, %arg1 : i32, i32, i32
  }
  func.func @transform_4(%arg0: i32, %arg1: i32, %arg2: i32, %arg3: i32) -> (i32, i32, i32) {
    %c0_i32 = arith.constant 0 : i32
    %c0_i32_0 = arith.constant 0 : i32
    return %arg0, %c0_i32, %arg1 : i32, i32, i32
  }
}

module attributes {stable_mosaic.version = 11 : i64} {
  func.func @_se_fc_kernel(%arg0: memref<2x1x128xf32, #tpu.memory_space<vmem>>, %arg1: memref<128x128xbf16, #tpu.memory_space<vmem>>, %arg2: memref<1x128xf32, #tpu.memory_space<vmem>>, %arg3: memref<128x128xbf16, #tpu.memory_space<vmem>>, %arg4: memref<1x128xf32, #tpu.memory_space<vmem>>, %arg5: memref<2x1x128xf32, #tpu.memory_space<vmem>>) attributes {dimension_semantics = [], scalar_prefetch = 0 : i64, scratch_operands = 0 : i64, tpu.core_type = #tpu.core_type<tc>} {
    %c0 = arith.constant 0 : index
    %c0_0 = arith.constant 0 : index
    %c0_1 = arith.constant 0 : index
    %0 = vector.load %arg0[%c0, %c0_0, %c0_1] : memref<2x1x128xf32, #tpu.memory_space<vmem>>, vector<2x1x128xf32>
    %1 = vector.shape_cast %0 : vector<2x1x128xf32> to vector<2x128xf32>
    %cst = arith.constant 1.562500e-02 : f32
    %2 = vector.broadcast %cst : f32 to vector<2x128xf32>
    %3 = arith.mulf %1, %2 : vector<2x128xf32>
    %4 = arith.truncf %3 : vector<2x128xf32> to vector<2x128xbf16>
    %c0_2 = arith.constant 0 : index
    %c0_3 = arith.constant 0 : index
    %5 = vector.load %arg1[%c0_2, %c0_3] : memref<128x128xbf16, #tpu.memory_space<vmem>>, vector<128x128xbf16>
    %cst_4 = arith.constant dense<0.000000e+00> : vector<2x128xf32>
    %6 = tpu.matmul %4, %5, %cst_4 {dimension_numbers = #tpu.dot_dimension_numbers<[1], [0], [0], [1], [0, 0, 1, 1], [], []>} : vector<2x128xbf16>, vector<128x128xbf16>, vector<2x128xf32> -> vector<2x128xf32>
    %c0_5 = arith.constant 0 : index
    %c0_6 = arith.constant 0 : index
    %7 = vector.load %arg2[%c0_5, %c0_6] : memref<1x128xf32, #tpu.memory_space<vmem>>, vector<1x128xf32>
    %8 = vector.broadcast %7 : vector<1x128xf32> to vector<2x128xf32>
    %9 = arith.addf %6, %8 : vector<2x128xf32>
    %cst_7 = arith.constant 0.000000e+00 : f32
    %10 = vector.broadcast %cst_7 : f32 to vector<2x128xf32>
    %11 = arith.maximumf %9, %10 : vector<2x128xf32>
    %12 = arith.truncf %11 : vector<2x128xf32> to vector<2x128xbf16>
    %c0_8 = arith.constant 0 : index
    %c0_9 = arith.constant 0 : index
    %13 = vector.load %arg3[%c0_8, %c0_9] : memref<128x128xbf16, #tpu.memory_space<vmem>>, vector<128x128xbf16>
    %cst_10 = arith.constant dense<0.000000e+00> : vector<2x128xf32>
    %14 = tpu.matmul %12, %13, %cst_10 {dimension_numbers = #tpu.dot_dimension_numbers<[1], [0], [0], [1], [0, 0, 1, 1], [], []>} : vector<2x128xbf16>, vector<128x128xbf16>, vector<2x128xf32> -> vector<2x128xf32>
    %c0_11 = arith.constant 0 : index
    %c0_12 = arith.constant 0 : index
    %15 = vector.load %arg4[%c0_11, %c0_12] : memref<1x128xf32, #tpu.memory_space<vmem>>, vector<1x128xf32>
    %16 = vector.broadcast %15 : vector<1x128xf32> to vector<2x128xf32>
    %17 = arith.addf %14, %16 : vector<2x128xf32>
    %18 = arith.negf %17 : vector<2x128xf32>
    %19 = math.exp %18 : vector<2x128xf32>
    %cst_13 = arith.constant 1.000000e+00 : f32
    %20 = vector.broadcast %cst_13 : f32 to vector<2x128xf32>
    %21 = arith.addf %20, %19 : vector<2x128xf32>
    %22 = arith.divf %20, %21 : vector<2x128xf32>
    %23 = tpu.iota {dimensions = array<i32: 1>} : vector<2x128xi32>
    %c8_i32 = arith.constant 8 : i32
    %24 = vector.broadcast %c8_i32 : i32 to vector<2x128xi32>
    %25 = arith.cmpi slt, %23, %24 : vector<2x128xi32>
    %cst_14 = arith.constant 0.000000e+00 : f32
    %26 = vector.broadcast %cst_14 : f32 to vector<2x128xf32>
    %27 = arith.select %25, %22, %26 : vector<2x128xi1>, vector<2x128xf32>
    %28 = vector.shape_cast %27 : vector<2x128xf32> to vector<2x1x128xf32>
    %c0_15 = arith.constant 0 : index
    %c0_16 = arith.constant 0 : index
    %c0_17 = arith.constant 0 : index
    %29 = vector.load %arg5[%c0_15, %c0_16, %c0_17] : memref<2x1x128xf32, #tpu.memory_space<vmem>>, vector<2x1x128xf32>
    tpu.vector_store %arg5[%c0_15, %c0_16, %c0_17], %28 {strides = array<i32>} : memref<2x1x128xf32, #tpu.memory_space<vmem>>, vector<2x1x128xf32>,
    return
  }
}

module attributes {stable_mosaic.version = 11 : i64} {
  func.func @_se_add_convsc_kernel(%arg0: i32, %arg1: i32, %arg2: memref<1x64x128xbf16, #tpu.memory_space<vmem>>, %arg3: memref<1x1x128xf32, #tpu.memory_space<vmem>>, %arg4: memref<1x64x128xbf16, #tpu.memory_space<vmem>>, %arg5: memref<128x128xbf16, #tpu.memory_space<vmem>>, %arg6: memref<1x128xf32, #tpu.memory_space<vmem>>, %arg7: memref<1x64x128xbf16, #tpu.memory_space<vmem>>) attributes {dimension_semantics = [#tpu.dimension_semantics<parallel>, #tpu.dimension_semantics<parallel>], iteration_bounds = array<i64: 2, 1>, scalar_prefetch = 0 : i64, scratch_operands = 0 : i64, tpu.core_type = #tpu.core_type<tc>, window_params = [{transform_indices = @transform_0, window_bounds = array<i64: 1, 64, 128>}, {transform_indices = @transform_1, window_bounds = array<i64: 1, 1, 128>}, {transform_indices = @transform_2, window_bounds = array<i64: 1, 64, 128>}, {pipeline_mode = #tpu.pipeline_mode<synchronous>, transform_indices = @transform_3, window_bounds = array<i64: 128, 128>}, {pipeline_mode = #tpu.pipeline_mode<synchronous>, transform_indices = @transform_4, window_bounds = array<i64: 1, 128>}, {transform_indices = @transform_5, window_bounds = array<i64: 1, 64, 128>}]} {
    %c0 = arith.constant 0 : index
    %c0_0 = arith.constant 0 : index
    %c0_1 = arith.constant 0 : index
    %0 = vector.load %arg4[%c0, %c0_0, %c0_1] : memref<1x64x128xbf16, #tpu.memory_space<vmem>>, vector<1x64x128xbf16>
    %1 = vector.shape_cast %0 : vector<1x64x128xbf16> to vector<64x128xbf16>
    %c0_2 = arith.constant 0 : index
    %c0_3 = arith.constant 0 : index
    %2 = vector.load %arg5[%c0_2, %c0_3] : memref<128x128xbf16, #tpu.memory_space<vmem>>, vector<128x128xbf16>
    %cst = arith.constant dense<0.000000e+00> : vector<64x128xf32>
    %3 = tpu.matmul %1, %2, %cst {dimension_numbers = #tpu.dot_dimension_numbers<[1], [0], [0], [1], [0, 0, 1, 1], [], []>} : vector<64x128xbf16>, vector<128x128xbf16>, vector<64x128xf32> -> vector<64x128xf32>
    %c0_4 = arith.constant 0 : index
    %c0_5 = arith.constant 0 : index
    %4 = vector.load %arg6[%c0_4, %c0_5] : memref<1x128xf32, #tpu.memory_space<vmem>>, vector<1x128xf32>
    %5 = vector.broadcast %4 : vector<1x128xf32> to vector<64x128xf32>
    %6 = arith.addf %3, %5 : vector<64x128xf32>
    %c0_6 = arith.constant 0 : index
    %c0_7 = arith.constant 0 : index
    %c0_8 = arith.constant 0 : index
    %7 = vector.load %arg3[%c0_6, %c0_7, %c0_8] : memref<1x1x128xf32, #tpu.memory_space<vmem>>, vector<1x1x128xf32>
    %c0_9 = arith.constant 0 : index
    %c0_10 = arith.constant 0 : index
    %c0_11 = arith.constant 0 : index
    %8 = vector.load %arg2[%c0_9, %c0_10, %c0_11] : memref<1x64x128xbf16, #tpu.memory_space<vmem>>, vector<1x64x128xbf16>
    %9 = arith.extf %8 : vector<1x64x128xbf16> to vector<1x64x128xf32>
    %10 = vector.broadcast %7 : vector<1x1x128xf32> to vector<1x64x128xf32>
    %11 = arith.mulf %10, %9 : vector<1x64x128xf32>
    %12 = vector.shape_cast %6 : vector<64x128xf32> to vector<1x64x128xf32>
    %13 = arith.addf %11, %12 : vector<1x64x128xf32>
    %cst_12 = arith.constant 0.000000e+00 : f32
    %14 = vector.broadcast %cst_12 : f32 to vector<1x64x128xf32>
    %15 = arith.maximumf %13, %14 : vector<1x64x128xf32>
    %16 = arith.truncf %15 : vector<1x64x128xf32> to vector<1x64x128xbf16>
    %c0_13 = arith.constant 0 : index
    %c0_14 = arith.constant 0 : index
    %c0_15 = arith.constant 0 : index
    %17 = vector.load %arg7[%c0_13, %c0_14, %c0_15] : memref<1x64x128xbf16, #tpu.memory_space<vmem>>, vector<1x64x128xbf16>
    tpu.vector_store %arg7[%c0_13, %c0_14, %c0_15], %16 {strides = array<i32>} : memref<1x64x128xbf16, #tpu.memory_space<vmem>>, vector<1x64x128xbf16>,
    return
  }
  func.func @transform_0(%arg0: i32, %arg1: i32) -> (i32, i32, i32) {
    %c0_i32 = arith.constant 0 : i32
    %c0_i32_0 = arith.constant 0 : i32
    return %arg0, %arg1, %c0_i32 : i32, i32, i32
  }
  func.func @transform_1(%arg0: i32, %arg1: i32) -> (i32, i32, i32) {
    %c0_i32 = arith.constant 0 : i32
    %c0_i32_0 = arith.constant 0 : i32
    %c0_i32_1 = arith.constant 0 : i32
    return %arg0, %c0_i32, %c0_i32_0 : i32, i32, i32
  }
  func.func @transform_2(%arg0: i32, %arg1: i32) -> (i32, i32, i32) {
    %c0_i32 = arith.constant 0 : i32
    %c0_i32_0 = arith.constant 0 : i32
    return %arg0, %arg1, %c0_i32 : i32, i32, i32
  }
  func.func @transform_3(%arg0: i32, %arg1: i32) -> (i32, i32) {
    %c0_i32 = arith.constant 0 : i32
    %c0_i32_0 = arith.constant 0 : i32
    %c0_i32_1 = arith.constant 0 : i32
    return %c0_i32, %c0_i32_0 : i32, i32
  }
  func.func @transform_4(%arg0: i32, %arg1: i32) -> (i32, i32) {
    %c0_i32 = arith.constant 0 : i32
    %c0_i32_0 = arith.constant 0 : i32
    %c0_i32_1 = arith.constant 0 : i32
    return %c0_i32, %c0_i32_0 : i32, i32
  }
  func.func @transform_5(%arg0: i32, %arg1: i32) -> (i32, i32, i32) {
    %c0_i32 = arith.constant 0 : i32
    %c0_i32_0 = arith.constant 0 : i32
    return %arg0, %arg1, %c0_i32 : i32, i32, i32
  }
}

</mosaic_0001>

<bundles_post_ra>
// kernel: basic_block_forward.4
= control target key start
LH: loop header
LB: loop body
LE: loop exit
PB: predicated region body
PF: predicated region fallthrough
CT: control target
= control target key end

     0   :  { %s842_s12 = smov 0   ;;  %s844_s13 = smov 0   ;;  %s915_s0 = inlined_call_operand.vmem [shape: bf16[2,64,128], index: 0, kind: input, shape index: {}]   ;;  %s916_s1 = inlined_call_operand.vmem [shape: bf16[128,128], index: 1, kind: input, shape index: {}]   ;;  %s917_s2 = inlined_call_operand.vmem [shape: f32[1,128], index: 2, kind: input, shape index: {}]   ;;  %s918_s3 = inlined_call_operand.vmem [shape: bf16[2,64,128], index: 3, kind: output, shape index: {}]  }
   0x1   :  { %s846_s14 = smov 0  }
   0x2 LB: > { %s39_s15 = sadd.s32 1, %s816_s13  ;;  %p649_p0 = scmp.ge.s32.totalorder %s820_s14, 1  ;;  %s820_s14 = sphi %s846_s14, %s13_s14   ;;  %s816_s13 = sphi %s844_s13, %s920_s13   ;;  %s812_s12 = sphi %s842_s12, %s919_s12  }
   0x3   : > { %p41_p1 = scmp.ge.s32.totalorder %s39_s15, 2  ;;  %p203_p2 = scmp.lt.s32.totalorder %s820_s14, 3 }
   0x5   : > { %s922_s15 = smov (%p41_p1, %s39_s15), 0  ;;  %p204_p3 = pnand %p649_p0, %p203_p2 }
   0x6   : > { %v786_v0 = vld [vmem:[%s916_s1] sm:$0xff] (!%p204_p3)   ;;  %p253_p4 = scmp.lt.s32.totalorder (!%p204_p3), %s812_s12, 1  ;;  %v787_v1 = vld [vmem:[%s916_s1 + $0x8] sm:$0xff] (!%p204_p3)   ;;  %v788_v2 = vld [vmem:[%s916_s1 + $0x10] sm:$0xff] (!%p204_p3)  }
   0x7   : > { %207 = sbr.rel (%p204_p3) target bundleno = 261 (0x105), region = 32  ;;  %722 = vmatprep.subr.bf16.mxu0 (!%p204_p3), %v786_v0  ;;  %746 = vmatprep.subr.bf16.mxu1 (!%p204_p3), %v786_v0  ;;  %v789_v3 = vld [vmem:[%s916_s1 + $0x18] sm:$0xff] (!%p204_p3)   ;;  %v790_v6 = vld [vmem:[%s916_s1 + $0x20] sm:$0xff] (!%p204_p3)   ;;  %v791_v7 = vld [vmem:[%s916_s1 + $0x28] sm:$0xff] (!%p204_p3)  }
   0x8   : > { %723 = vmatpush3.bf16.msra.mxu0 (!%p204_p3), %v786_v0  ;;  %754 = vmatpush3.bf16.msra.mxu1 (!%p204_p3), %v786_v0  ;;  %v792_v8 = vld [vmem:[%s916_s1 + $0x30] sm:$0xff] (!%p204_p3)   ;;  %v793_v9 = vld [vmem:[%s916_s1 + $0x38] sm:$0xff] (!%p204_p3)   ;;  %v654_v12 = vld [vmem:[%s917_s2] ss:$0 sm:$0xff] (!%p204_p3) }
   0x9   : > { %724 = vmatprep.subr.bf16.mxu0 (!%p204_p3), %v787_v1  ;;  %747 = vmatprep.subr.bf16.mxu1 (!%p204_p3), %v787_v1 }
   0xc   : > { %725 = vmatpush3.bf16.msra.mxu0 (!%p204_p3), %v787_v1  ;;  %755 = vmatpush3.bf16.msra.mxu1 (!%p204_p3), %v787_v1 }
   0xd   : > { %726 = vmatprep.subr.bf16.mxu0 (!%p204_p3), %v788_v2  ;;  %748 = vmatprep.subr.bf16.mxu1 (!%p204_p3), %v788_v2 }
   0xe   : > { %s924_s12 = smov (!%p253_p4, %s812_s12), 1 }
   0xf   : > { %s677_s22 = sshll.u32 %s924_s12, 5 }
  0x10   : > { %s877_s25 = scalar_lea.vmem %s915_s0, %s677_s22  ;;  %727 = vmatpush3.bf16.msra.mxu0 %v788_v2  ;;  %756 = vmatpush3.bf16.msra.mxu1 %v788_v2  ;;  %s288_s17 = scalar_lea.vmem %s918_s3, %s677_s22 }
  0x11   : > { %v794_v4 = vld [vmem:[%s877_s25] sm:$0xff]   ;;  %v795_v5 = vld [vmem:[%s877_s25 + $0x10] sm:$0xff]   ;;  %728 = vmatprep.subr.bf16.mxu0 %v789_v3  ;;  %749 = vmatprep.subr.bf16.mxu1 %v789_v3  ;;  %v796_v10 = vld [vmem:[%s877_s25 + $0x8] sm:$0xff]  }
  0x12   : > { %738 = vmatprep.mubr.bf16.mxu0 %v794_v4  ;;  %742 = vmatprep.mubr.bf16.mxu1 %v795_v5  ;;  %v797_v11 = vld [vmem:[%s877_s25 + $0x18] sm:$0xff]  }
  0x14   : > { %729 = vmatpush3.bf16.msra.mxu0 %v789_v3  ;;  %757 = vmatpush3.bf16.msra.mxu1 %v789_v3 }
  0x15   : > { %730 = vmatprep.subr.bf16.mxu0 %v790_v6  ;;  %750 = vmatprep.subr.bf16.mxu1 %v790_v6 }
  0x18   : > { %731 = vmatpush3.bf16.msra.mxu0 %v790_v6  ;;  %758 = vmatpush3.bf16.msra.mxu1 %v790_v6 }
  0x19   : > { %732 = vmatprep.subr.bf16.mxu0 %v791_v7  ;;  %751 = vmatprep.subr.bf16.mxu1 %v791_v7 }
  0x1c   : > { %733 = vmatpush3.bf16.msra.mxu0 %v791_v7  ;;  %759 = vmatpush3.bf16.msra.mxu1 %v791_v7 }
  0x1d   : > { %734 = vmatprep.subr.bf16.mxu0 %v792_v8  ;;  %752 = vmatprep.subr.bf16.mxu1 %v792_v8 }
  0x20   : > { %735 = vmatpush3.bf16.msra.mxu0 %v792_v8  ;;  %760 = vmatpush3.bf16.msra.mxu1 %v792_v8 }
  0x21   : > { %736 = vmatprep.subr.bf16.mxu0 %v793_v9  ;;  %753 = vmatprep.subr.bf16.mxu1 %v793_v9 }
  0x24   : > { %737 = vmatpush3.bf16.msra.mxu0 %v793_v9  ;;  %761 = vmatpush3.bf16.msra.mxu1 %v793_v9 }
  0x27   : > { %739 = vmatmul.mubr.bf16.vlgmr.msra.gmra.mrb[0].mxu0 %v796_v10  ;;  %743 = vmatmul.mubr.bf16.vlgmr.msra.gmra.mrb[0].mxu1 %v797_v11 }
  0xfa   : > { %v740_v13 = vpop.f32.mrb[0].mxu0  ;;  %v744_v14 = vpop.f32.mrb[0].mxu1 }
  0xfb   : > { %v437_v15 = vadd.f32 %v740_v13, %v654_v12  ;;  %v453_v16 = vadd.f32 %v744_v14, %v654_v12  ;;  %v428_v17 = vpop.f32.mrb[1].mxu0  ;;  %v444_v18 = vpop.f32.mrb[1].mxu1 }
  0xfc   : > { %v429_v19 = vadd.f32 %v654_v12, %v428_v17  ;;  %v445_v20 = vadd.f32 %v654_v12, %v444_v18  ;;  %v741_v21 = vpop.f32.mrb[2].mxu0  ;;  %v745_v22 = vpop.f32.mrb[2].mxu1 }
  0xfd   : > { %v440_v23 = vadd.f32 %v741_v21, %v654_v12  ;;  %v456_v24 = vadd.f32 %v745_v22, %v654_v12  ;;  %v431_v25 = vpop.f32.mrb[3].mxu0  ;;  %v447_v26 = vpop.f32.mrb[3].mxu1  ;;  %v461_v29 = vmax.f32 %v437_v15, 0.0  ;;  %v465_v30 = vmax.f32 %v453_v16, 0.0 }
  0xfe   : > { %v432_v27 = vadd.f32 %v654_v12, %v431_v25  ;;  %v448_v28 = vadd.f32 %v654_v12, %v447_v26  ;;  %v459_v33 = vmax.f32 %v429_v19, 0.0  ;;  %v463_v34 = vmax.f32 %v445_v20, 0.0 }
  0xff   : > { %v462_v31 = vmax.f32 %v440_v23, 0.0  ;;  %v466_v32 = vmax.f32 %v456_v24, 0.0 }
 0x100   : > { %v460_v35 = vmax.f32 %v432_v27, 0.0  ;;  %v464_v36 = vmax.f32 %v448_v28, 0.0 }
 0x101   : > { %v695_v37 = vpack.c.bf16 %v462_v31, %v461_v29  ;;  %v705_v38 = vpack.c.bf16 %v466_v32, %v465_v30 }
 0x102   : > { %v690_v39 = vpack.c.bf16 %v460_v35, %v459_v33  ;;  %v700_v40 = vpack.c.bf16 %v464_v36, %v463_v34 }
 0x103   : > { %707 = vst [vmem:[%s288_s17 + $0x8] sm:$0xff] %v695_v37   ;;  %709 = vst [vmem:[%s288_s17 + $0x18] sm:$0xff] %v705_v38  }
 0x104   : > { %691 = vst [vmem:[%s288_s17] sm:$0xff] %v690_v39   ;;  %708 = vst [vmem:[%s288_s17 + $0x10] sm:$0xff] %v700_v40  }
 0x105 PF: > { %s13_s14 = sadd.s32 1, %s820_s14   ;;  %s919_s12 = smov %s816_s13 }
 0x106   : > { %p10_p5 = scmp.ge.s32.totalorder %s13_s14, 4   ;;  %s920_s13 = smov %s922_s15 }
 0x108   :  { %12 = sbr.rel (!%p10_p5) target bundleno = 2 (0x2), region = 68 }

// kernel: basic_block_forward.5
= control target key start
LH: loop header
LB: loop body
LE: loop exit
PB: predicated region body
PF: predicated region fallthrough
CT: control target
= control target key end

     0   :  { %s976_s15 = smov 0   ;;  %s978_s16 = smov 0   ;;  %s1058_s0 = inlined_call_operand.vmem [shape: bf16[2,64,128], index: 0, kind: input, shape index: {}]   ;;  %s1059_s1 = inlined_call_operand.vmem [shape: bf16[128,128], index: 1, kind: input, shape index: {}]   ;;  %s1060_s2 = inlined_call_operand.vmem [shape: f32[1,128], index: 2, kind: input, shape index: {}]   ;;  %s1061_s3 = inlined_call_operand.vmem [shape: bf16[2,64,128], index: 3, kind: output, shape index: {0}]   ;;  %s1062_s4 = inlined_call_operand.vmem [shape: f32[2,1,128], index: 4, kind: output, shape index: {1}]  }
   0x1   :  { %s980_s17 = smov 0  }
   0x2 LB: > { %s41_s18 = sadd.s32 1, %s944_s16  ;;  %p776_p0 = scmp.ge.s32.totalorder %s948_s17, 1  ;;  %s948_s17 = sphi %s980_s17, %s15_s17   ;;  %s944_s16 = sphi %s978_s16, %s1064_s16   ;;  %s940_s15 = sphi %s976_s15, %s1063_s15  }
   0x3   : > { %p43_p1 = scmp.ge.s32.totalorder %s41_s18, 2  ;;  %p233_p2 = scmp.lt.s32.totalorder %s948_s17, 3 }
   0x5   : > { %s1066_s18 = smov (%p43_p1, %s41_s18), 0  ;;  %p234_p3 = pnand %p776_p0, %p233_p2 }
   0x6   : > { %v914_v0 = vld [vmem:[%s1059_s1] sm:$0xff] (!%p234_p3)   ;;  %p291_p4 = scmp.lt.s32.totalorder (!%p234_p3), %s940_s15, 1  ;;  %v915_v1 = vld [vmem:[%s1059_s1 + $0x8] sm:$0xff] (!%p234_p3)   ;;  %v916_v2 = vld [vmem:[%s1059_s1 + $0x10] sm:$0xff] (!%p234_p3)   ;;  %v950_v12 = vmov (!%p234_p3), 0.0  }
   0x7   : > { %237 = sbr.rel (%p234_p3) target bundleno = 285 (0x11d), region = 32  ;;  %849 = vmatprep.subr.bf16.mxu0 (!%p234_p3), %v914_v0  ;;  %873 = vmatprep.subr.bf16.mxu1 (!%p234_p3), %v914_v0  ;;  %v917_v3 = vld [vmem:[%s1059_s1 + $0x18] sm:$0xff] (!%p234_p3)   ;;  %v918_v6 = vld [vmem:[%s1059_s1 + $0x20] sm:$0xff] (!%p234_p3)   ;;  %v919_v7 = vld [vmem:[%s1059_s1 + $0x28] sm:$0xff] (!%p234_p3)  }
   0x8   : > { %850 = vmatpush3.bf16.msra.mxu0 (!%p234_p3), %v914_v0  ;;  %881 = vmatpush3.bf16.msra.mxu1 (!%p234_p3), %v914_v0  ;;  %v920_v8 = vld [vmem:[%s1059_s1 + $0x30] sm:$0xff] (!%p234_p3)   ;;  %v921_v9 = vld [vmem:[%s1059_s1 + $0x38] sm:$0xff] (!%p234_p3)   ;;  %v781_v14 = vld [vmem:[%s1060_s2] ss:$0 sm:$0xff] (!%p234_p3) }
   0x9   : > { %851 = vmatprep.subr.bf16.mxu0 (!%p234_p3), %v915_v1  ;;  %874 = vmatprep.subr.bf16.mxu1 (!%p234_p3), %v915_v1 }
   0xc   : > { %852 = vmatpush3.bf16.msra.mxu0 (!%p234_p3), %v915_v1  ;;  %882 = vmatpush3.bf16.msra.mxu1 (!%p234_p3), %v915_v1 }
   0xd   : > { %853 = vmatprep.subr.bf16.mxu0 (!%p234_p3), %v916_v2  ;;  %875 = vmatprep.subr.bf16.mxu1 (!%p234_p3), %v916_v2 }
   0xe   : > { %s1068_s15 = smov (!%p291_p4, %s940_s15), 1 }
   0xf   : > { %s804_s25 = sshll.u32 %s1068_s15, 5  ;;  %s1036_s19 = scalar_lea.vmem %s1062_s4, %s1068_s15 }
  0x10   : > { %s1011_s28 = scalar_lea.vmem %s1058_s0, %s804_s25  ;;  %854 = vmatpush3.bf16.msra.mxu0 %v916_v2  ;;  %883 = vmatpush3.bf16.msra.mxu1 %v916_v2  ;;  %547 = vst [vmem:[%s1036_s19] sm:$0x1] %v950_v12  ;;  %s326_s24 = scalar_lea.vmem %s1061_s3, %s804_s25 }
  0x11   : > { %v922_v4 = vld [vmem:[%s1011_s28] sm:$0xff]   ;;  %v924_v5 = vld [vmem:[%s1011_s28 + $0x10] sm:$0xff]   ;;  %855 = vmatprep.subr.bf16.mxu0 %v917_v3  ;;  %876 = vmatprep.subr.bf16.mxu1 %v917_v3  ;;  %v923_v10 = vld [vmem:[%s1011_s28 + $0x8] sm:$0xff]  }
  0x12   : > { %865 = vmatprep.mubr.bf16.mxu0 %v922_v4  ;;  %869 = vmatprep.mubr.bf16.mxu1 %v924_v5  ;;  %v925_v11 = vld [vmem:[%s1011_s28 + $0x18] sm:$0xff]  }
  0x14   : > { %856 = vmatpush3.bf16.msra.mxu0 %v917_v3  ;;  %884 = vmatpush3.bf16.msra.mxu1 %v917_v3 }
  0x15   : > { %857 = vmatprep.subr.bf16.mxu0 %v918_v6  ;;  %877 = vmatprep.subr.bf16.mxu1 %v918_v6 }
  0x17   : > { %v583_v46 = vld [vmem:[%s1036_s19] sm:$0x1] }
  0x18   : > { %858 = vmatpush3.bf16.msra.mxu0 %v918_v6  ;;  %885 = vmatpush3.bf16.msra.mxu1 %v918_v6 }
  0x19   : > { %859 = vmatprep.subr.bf16.mxu0 %v919_v7  ;;  %878 = vmatprep.subr.bf16.mxu1 %v919_v7 }
  0x1c   : > { %860 = vmatpush3.bf16.msra.mxu0 %v919_v7  ;;  %886 = vmatpush3.bf16.msra.mxu1 %v919_v7 }
  0x1d   : > { %861 = vmatprep.subr.bf16.mxu0 %v920_v8  ;;  %879 = vmatprep.subr.bf16.mxu1 %v920_v8 }
  0x20   : > { %862 = vmatpush3.bf16.msra.mxu0 %v920_v8  ;;  %887 = vmatpush3.bf16.msra.mxu1 %v920_v8 }
  0x21   : > { %863 = vmatprep.subr.bf16.mxu0 %v921_v9  ;;  %880 = vmatprep.subr.bf16.mxu1 %v921_v9 }
  0x24   : > { %864 = vmatpush3.bf16.msra.mxu0 %v921_v9  ;;  %888 = vmatpush3.bf16.msra.mxu1 %v921_v9 }
  0x27   : > { %866 = vmatmul.mubr.bf16.vlgmr.msra.gmra.mrb[0].mxu0 %v923_v10  ;;  %870 = vmatmul.mubr.bf16.vlgmr.msra.gmra.mrb[0].mxu1 %v925_v11 }
  0xfa   : > { %v867_v13 = vpop.f32.mrb[0].mxu0  ;;  %v871_v15 = vpop.f32.mrb[0].mxu1 }
  0xfb   : > { %v472_v16 = vpop.f32.mrb[1].mxu0  ;;  %v497_v17 = vadd.f32 %v871_v15, %v781_v14  ;;  %v488_v18 = vpop.f32.mrb[1].mxu1  ;;  %v481_v22 = vadd.f32 %v867_v13, %v781_v14 }
  0xfc   : > { %v868_v19 = vpop.f32.mrb[2].mxu0  ;;  %v489_v20 = vadd.f32 %v781_v14, %v488_v18  ;;  %v872_v21 = vpop.f32.mrb[2].mxu1  ;;  %v473_v27 = vadd.f32 %v781_v14, %v472_v16 }
  0xfd   : > { %v484_v23 = vadd.f32 %v868_v19, %v781_v14  ;;  %v475_v24 = vpop.f32.mrb[3].mxu0  ;;  %v500_v25 = vadd.f32 %v872_v21, %v781_v14  ;;  %v491_v26 = vpop.f32.mrb[3].mxu1 }
  0xfe   : > { %v476_v28 = vadd.f32 %v781_v14, %v475_v24  ;;  %v492_v29 = vadd.f32 %v781_v14, %v491_v26 }
  0xff   : > { %v822_v30 = vpack.c.bf16 %v484_v23, %v481_v22  ;;  %v832_v31 = vpack.c.bf16 %v500_v25, %v497_v17 }
 0x100   : > { %v817_v32 = vpack.c.bf16 %v476_v28, %v473_v27  ;;  %v584_v33 = vadd.f32 %v476_v28, %v473_v27  ;;  %v827_v34 = vpack.c.bf16 %v492_v29, %v489_v20 }
 0x101   : > { %834 = vst [vmem:[%s326_s24 + $0x8] sm:$0xff] %v822_v30   ;;  %836 = vst [vmem:[%s326_s24 + $0x18] sm:$0xff] %v832_v31  }
 0x102   : > { %818 = vst [vmem:[%s326_s24] sm:$0xff] %v817_v32   ;;  %v585_v35 = vadd.f32 %v584_v33, %v481_v22  ;;  %835 = vst [vmem:[%s326_s24 + $0x10] sm:$0xff] %v827_v34  }
 0x104   : > { %v586_v36 = vadd.f32 %v585_v35, %v484_v23 }
 0x106   : > { %v587_v37 = vadd.f32 %v586_v36, %v489_v20 }
 0x108   : > { %v588_v38 = vadd.f32 %v587_v37, %v492_v29 }
 0x10a   : > { %v589_v39 = vadd.f32 %v588_v38, %v497_v17 }
 0x10c   : > { %v590_v40 = vadd.f32 %v589_v39, %v500_v25 }
 0x10e   : > { %v591_v41 = vrot.slane %v590_v40, 4 }
 0x110   : > { %v592_v42 = vadd.f32 %v591_v41, %v590_v40 }
 0x112   : > { %v593_v43 = vrot.slane %v592_v42, 2 }
 0x114   : > { %v594_v44 = vadd.f32 %v593_v43, %v592_v42 }
 0x116   : > { %v595_v45 = vrot.slane %v594_v44, 1 }
 0x118   : > { %v596_v47 = vadd.f32 %v595_v45, %v594_v44 }
 0x11a   : > { %v597_v48 = vadd.f32 %v596_v47, %v583_v46 }
 0x11c   : > { %598 = vst [vmem:[%s1036_s19] sm:$0x1] %v597_v48 }
 0x11d PF: > { %s15_s17 = sadd.s32 1, %s948_s17   ;;  %s1063_s15 = smov %s944_s16 }
 0x11e   : > { %p12_p5 = scmp.ge.s32.totalorder %s15_s17, 4   ;;  %s1064_s16 = smov %s1066_s18 }
 0x120   :  { %14 = sbr.rel (!%p12_p5) target bundleno = 2 (0x2), region = 84 }

// kernel: basic_block_forward.6
= control target key start
LH: loop header
LB: loop body
LE: loop exit
PB: predicated region body
PF: predicated region fallthrough
CT: control target
= control target key end

     0   :  { %v403_v0 = vmov 0.0   ;;  %vm404_vm0 = vmmov 0   ;;  %vm55_vm1 = vcmask 1041409   ;;  %v266_v45 = vlaneseq  ;;  %s520_s1 = inlined_call_operand.vmem [shape: bf16[128,128], index: 1, kind: input, shape index: {}]   ;;  %s521_s0 = inlined_call_operand.vmem [shape: f32[2,1,128], index: 0, kind: input, shape index: {}]   ;;  %s522_s3 = inlined_call_operand.vmem [shape: bf16[128,128], index: 3, kind: input, shape index: {}]   ;;  %s523_s2 = inlined_call_operand.vmem [shape: f32[1,128], index: 2, kind: input, shape index: {}]   ;;  %s524_s4 = inlined_call_operand.vmem [shape: f32[1,128], index: 4, kind: input, shape index: {}]   ;;  %s525_s5 = inlined_call_operand.vmem [shape: f32[2,1,128], index: 5, kind: output, shape index: {}]  }
   0x1   :  { %340 = vmatprep.subr.bf16.mxu0 %v403_v0  ;;  %v383_v1 = vld [vmem:[%s520_s1] sm:$0xff]   ;;  %356 = vmatprep.mubr.msk.bf16.mxu0 %vm404_vm0, %v403_v0  ;;  %v384_v2 = vld [vmem:[%s520_s1 + $0x8] sm:$0xff]   ;;  %v385_v3 = vld [vmem:[%s520_s1 + $0x10] sm:$0xff]   ;;  %v405_v46 = vmov 1966171168  }
   0x2   :  { %360 = vmatprep.subr.bf16.mxu1 %v403_v0  ;;  %376 = vmatprep.mubr.msk.bf16.mxu1 %vm404_vm0, %v403_v0  ;;  %v386_v4 = vld [vmem:[%s520_s1 + $0x18] sm:$0xff]   ;;  %v22_v5 = vld [vmem:[%s521_s0 + $0x1] sm:$0x1]  ;;  %v21_v6 = vld [vmem:[%s521_s0] sm:$0x1]  ;;  %v272_v47 = vunpack.c.l.s4 %v405_v46  ;;  %v267_v48 = vand.u32 127, %v266_v45 }
   0x3   :  { %341 = vmatpush3.bf16.msra.mxu0 %v383_v1  ;;  %v24_v7 = vmul.f32 0.015625, %v22_v5  ;;  %v391_v8 = vld [vmem:[%s522_s3] sm:$0xff]   ;;  %v392_v9 = vld [vmem:[%s522_s3 + $0x8] sm:$0xff]   ;;  %v23_v11 = vmul.f32 0.015625, %v21_v6  ;;  %v393_v13 = vld [vmem:[%s522_s3 + $0x10] sm:$0xff]   ;;  %v275_v50 = vshrl.u32 %v266_v45, 7 }
   0x4   :  { %342 = vmatprep.subr.bf16.mxu0 %v403_v0  ;;  %361 = vmatpush3.bf16.msra.mxu1 %v391_v8  ;;  %v387_v10 = vld [vmem:[%s520_s1 + $0x20] sm:$0xff]   ;;  %v388_v14 = vld [vmem:[%s520_s1 + $0x28] sm:$0xff]   ;;  %v394_v17 = vld [vmem:[%s522_s3 + $0x18] sm:$0xff]   ;;  %v273_v49 = vunpack.c.0.s8 %v272_v47  ;;  %vm268_vm2 = vcmp.lt.s32.totalorder %v267_v48, 8 }
   0x5   :  { %362 = vmatprep.subr.bf16.mxu1 %v403_v0  ;;  %v26_v12 = vpack.c.bf16 %v24_v7, %v24_v7  ;;  %v25_v15 = vpack.c.bf16 %v23_v11, %v23_v11  ;;  %v389_v18 = vld [vmem:[%s520_s1 + $0x30] sm:$0xff]   ;;  %v395_v21 = vld [vmem:[%s522_s3 + $0x20] sm:$0xff]   ;;  %v390_v22 = vld [vmem:[%s520_s1 + $0x38] sm:$0xff]  }
   0x6   :  { %v396_v24 = vld [vmem:[%s522_s3 + $0x28] sm:$0xff]   ;;  %v397_v26 = vld [vmem:[%s522_s3 + $0x30] sm:$0xff]   ;;  %v398_v27 = vld [vmem:[%s522_s3 + $0x38] sm:$0xff]   ;;  %v276_v51 = vsub.s32 %v273_v49, %v275_v50 }
   0x7   :  { %343 = vmatpush3.bf16.msra.mxu0 %v384_v2  ;;  %v53_v16 = vunpack.c.l.b16 %v26_v12  ;;  %v52_v19 = vunpack.c.l.b16 %v25_v15  ;;  %v301_v28 = vld [vmem:[%s523_s2] ss:$0 sm:$0xff] }
   0x8   :  { %344 = vmatprep.subr.bf16.mxu0 %v403_v0  ;;  %363 = vmatpush3.bf16.msra.mxu1 %v392_v9  ;;  %v310_v36 = vld [vmem:[%s524_s4] ss:$0 sm:$0xff] }
   0x9   :  { %364 = vmatprep.subr.bf16.mxu1 %v403_v0  ;;  %v54_v20 = vrot.slane %v53_v16, 7 }
   0xb   :  { %345 = vmatpush3.bf16.msra.mxu0 %v385_v3  ;;  %v56_v23 = vsel %vm55_vm1, %v54_v20, %v52_v19 }
   0xc   :  { %346 = vmatprep.subr.bf16.mxu0 %v403_v0  ;;  %365 = vmatpush3.bf16.msra.mxu1 %v393_v13  ;;  %v57_v25 = vpack.c.b16 %v56_v23, %v56_v23 }
   0xd   :  { %366 = vmatprep.subr.bf16.mxu1 %v403_v0 }
   0xf   :  { %347 = vmatpush3.bf16.msra.mxu0 %v386_v4 }
  0x10   :  { %348 = vmatprep.subr.bf16.mxu0 %v403_v0  ;;  %367 = vmatpush3.bf16.msra.mxu1 %v394_v17 }
  0x11   :  { %368 = vmatprep.subr.bf16.mxu1 %v403_v0 }
  0x13   :  { %349 = vmatpush3.bf16.msra.mxu0 %v387_v10 }
  0x14   :  { %350 = vmatprep.subr.bf16.mxu0 %v403_v0  ;;  %369 = vmatpush3.bf16.msra.mxu1 %v395_v21 }
  0x15   :  { %370 = vmatprep.subr.bf16.mxu1 %v403_v0 }
  0x17   :  { %351 = vmatpush3.bf16.msra.mxu0 %v388_v14 }
  0x18   :  { %352 = vmatprep.subr.bf16.mxu0 %v403_v0  ;;  %371 = vmatpush3.bf16.msra.mxu1 %v396_v24 }
  0x19   :  { %372 = vmatprep.subr.bf16.mxu1 %v403_v0 }
  0x1b   :  { %353 = vmatpush3.bf16.msra.mxu0 %v389_v18 }
  0x1c   :  { %354 = vmatprep.subr.bf16.mxu0 %v403_v0  ;;  %373 = vmatpush3.bf16.msra.mxu1 %v397_v26 }
  0x1d   :  { %374 = vmatprep.subr.bf16.mxu1 %v403_v0 }
  0x1f   :  { %355 = vmatpush3.bf16.msra.mxu0 %v390_v22 }
  0x20   :  { %375 = vmatpush3.bf16.msra.mxu1 %v398_v27 }
  0x22   :  { %357 = vmatmul.mubr.bf16.vlgmr.msra.gmra.mrb[0].mxu0 %v57_v25 }
  0xf5   :  { %v141_v29 = vpop.f32.mrb[0].mxu0 }
  0xf6   :  { %v142_v30 = vadd.f32 %v301_v28, %v141_v29  ;;  %v358_v31 = vpop.f32.mrb[1].mxu0 }
  0xf7   :  { %v144_v32 = vpop.f32.mrb[2].mxu0 }
  0xf8   :  { %v147_v33 = vmax.f32 %v142_v30, 0.0  ;;  %v359_v34 = vpop.f32.mrb[3].mxu0 }
  0xfa   :  { %v148_v35 = vpack.c.bf16 %v147_v33, %v147_v33 }
  0xfc   :  { %377 = vmatmul.mubr.bf16.vlgmr.msra.gmra.mrb[0].mxu1 %v148_v35 }
 0x1cf   :  { %v254_v37 = vpop.f32.mrb[0].mxu1 }
 0x1d0   :  { %v255_v38 = vadd.f32 %v310_v36, %v254_v37  ;;  %v378_v39 = vpop.f32.mrb[1].mxu1 }
 0x1d1   :  { %v257_v40 = vpop.f32.mrb[2].mxu1 }
 0x1d2   :  { %v319_v41 = vmul.f32 -1.442695, %v255_v38  ;;  %v379_v42 = vpop.f32.mrb[3].mxu1 }
 0x1d4   :  { %399 = vpow2.f32 %v319_v41 }
 0x1de   :  { %v400_v43 = vpop.eup %399 }
 0x1df   :  { %v263_v44 = vadd.f32 1.0, %v400_v43 }
 0x1e1   :  { %401 = vrcp.f32 %v263_v44 }
 0x1eb   :  { %v402_v52 = vpop.eup %401 }
 0x1ec   :  { %v269_v53 = vsel %vm268_vm2, %v402_v52, 0.0 }
 0x1ed   :  { %v277_v54 = vrot.slane %v269_v53, %v276_v51 }
 0x1ef   :  { %v278_v55 = vcombine.high %v277_v54, %v277_v54  ;;  %320 = vst.sshfl [vmem:[%s525_s5] sm:$0x1 pattern:$0x73625140] %v277_v54 }
 0x1f1   :  { %321 = vst.sshfl [vmem:[%s525_s5 + $0x1] sm:$0x1 pattern:$0x73625140] %v278_v55 }

// kernel: basic_block_forward.7
= control target key start
LH: loop header
LB: loop body
LE: loop exit
PB: predicated region body
PF: predicated region fallthrough
CT: control target
= control target key end

     0   :  { %s914_s18 = smov 0   ;;  %s916_s19 = smov 0   ;;  %s995_s0 = inlined_call_operand.vmem [shape: bf16[2,64,128], index: 0, kind: input, shape index: {}]   ;;  %s996_s1 = inlined_call_operand.vmem [shape: f32[2,1,128], index: 1, kind: input, shape index: {}]   ;;  %s997_s2 = inlined_call_operand.vmem [shape: bf16[2,64,128], index: 2, kind: input, shape index: {}]   ;;  %s998_s3 = inlined_call_operand.vmem [shape: bf16[128,128], index: 3, kind: input, shape index: {}]   ;;  %s999_s4 = inlined_call_operand.vmem [shape: f32[1,128], index: 4, kind: input, shape index: {}]   ;;  %s1000_s5 = inlined_call_operand.vmem [shape: bf16[2,64,128], index: 5, kind: output, shape index: {}]  }
   0x1   :  { %s918_s20 = smov 0  }
   0x2 LB: > { %s27_s21 = sadd.s32 1, %s878_s19  ;;  %p688_p0 = scmp.ge.s32.totalorder %s882_s20, 1  ;;  %s882_s20 = sphi %s918_s20, %s15_s20   ;;  %s878_s19 = sphi %s916_s19, %s1002_s19   ;;  %s874_s18 = sphi %s914_s18, %s1001_s18  }
   0x3   : > { %p29_p1 = scmp.ge.s32.totalorder %s27_s21, 2  ;;  %p233_p2 = scmp.lt.s32.totalorder %s882_s20, 3 }
   0x5   : > { %s1004_s21 = smov (%p29_p1, %s27_s21), 0  ;;  %p234_p3 = pnand %p688_p0, %p233_p2 }
   0x6   : > { %v848_v0 = vld [vmem:[%s998_s3] sm:$0xff] (!%p234_p3)   ;;  %p282_p4 = scmp.lt.s32.totalorder (!%p234_p3), %s874_s18, 1  ;;  %v849_v1 = vld [vmem:[%s998_s3 + $0x8] sm:$0xff] (!%p234_p3)   ;;  %v850_v2 = vld [vmem:[%s998_s3 + $0x10] sm:$0xff] (!%p234_p3)  }
   0x7   : > { %237 = sbr.rel (%p234_p3) target bundleno = 263 (0x107), region = 40  ;;  %784 = vmatprep.subr.bf16.mxu0 (!%p234_p3), %v848_v0  ;;  %808 = vmatprep.subr.bf16.mxu1 (!%p234_p3), %v848_v0  ;;  %v851_v3 = vld [vmem:[%s998_s3 + $0x18] sm:$0xff] (!%p234_p3)   ;;  %v852_v6 = vld [vmem:[%s998_s3 + $0x20] sm:$0xff] (!%p234_p3)   ;;  %v853_v7 = vld [vmem:[%s998_s3 + $0x28] sm:$0xff] (!%p234_p3)  }
   0x8   : > { %785 = vmatpush3.bf16.msra.mxu0 (!%p234_p3), %v848_v0  ;;  %816 = vmatpush3.bf16.msra.mxu1 (!%p234_p3), %v848_v0  ;;  %v854_v8 = vld [vmem:[%s998_s3 + $0x30] sm:$0xff] (!%p234_p3)   ;;  %v855_v9 = vld [vmem:[%s998_s3 + $0x38] sm:$0xff] (!%p234_p3)   ;;  %v695_v23 = vld [vmem:[%s999_s4] ss:$0 sm:$0xff] (!%p234_p3) }
   0x9   : > { %786 = vmatprep.subr.bf16.mxu0 (!%p234_p3), %v849_v1  ;;  %809 = vmatprep.subr.bf16.mxu1 (!%p234_p3), %v849_v1 }
   0xc   : > { %787 = vmatpush3.bf16.msra.mxu0 (!%p234_p3), %v849_v1  ;;  %817 = vmatpush3.bf16.msra.mxu1 (!%p234_p3), %v849_v1 }
   0xd   : > { %788 = vmatprep.subr.bf16.mxu0 (!%p234_p3), %v850_v2  ;;  %810 = vmatprep.subr.bf16.mxu1 (!%p234_p3), %v850_v2 }
   0xe   : > { %s1006_s18 = smov (!%p282_p4, %s874_s18), 1 }
   0xf   : > { %s944_s28 = sshll.u32 %s1006_s18, 5  ;;  %s293_s26 = scalar_lea.vmem %s996_s1, %s1006_s18 }
  0x10   : > { %s950_s6 = scalar_lea.vmem %s997_s2, %s944_s28  ;;  %789 = vmatpush3.bf16.msra.mxu0 %v850_v2  ;;  %818 = vmatpush3.bf16.msra.mxu1 %v850_v2  ;;  %s289_s23 = scalar_lea.vmem %s995_s0, %s944_s28  ;;  %v708_v18 = vld [vmem:[%s293_s26] ss:$0 sm:$0xff] }
  0x11   : > { %v856_v4 = vld [vmem:[%s950_s6] sm:$0xff]   ;;  %v857_v5 = vld [vmem:[%s950_s6 + $0x10] sm:$0xff]   ;;  %790 = vmatprep.subr.bf16.mxu0 %v851_v3  ;;  %811 = vmatprep.subr.bf16.mxu1 %v851_v3  ;;  %v858_v10 = vld [vmem:[%s950_s6 + $0x8] sm:$0xff]  }
  0x12   : > { %800 = vmatprep.mubr.bf16.mxu0 %v856_v4  ;;  %804 = vmatprep.mubr.bf16.mxu1 %v857_v5  ;;  %v859_v11 = vld [vmem:[%s950_s6 + $0x18] sm:$0xff]   ;;  %v766_v12 = vld [vmem:[%s289_s23 + $0x8] sm:$0xff]   ;;  %v731_v14 = vld [vmem:[%s289_s23] sm:$0xff]   ;;  %s312_s6 = scalar_lea.vmem %s1000_s5, %s944_s28 }
  0x13   : > { %v768_v13 = vld [vmem:[%s289_s23 + $0x18] sm:$0xff]   ;;  %v767_v15 = vld [vmem:[%s289_s23 + $0x10] sm:$0xff]   ;;  %v736_v16 = vunpack.c.l.bf16 %v766_v12  ;;  %v732_v19 = vunpack.c.l.bf16 %v731_v14  ;;  %v737_v21 = vunpack.c.h.bf16 %v766_v12  ;;  %v733_v24 = vunpack.c.h.bf16 %v731_v14 }
  0x14   : > { %791 = vmatpush3.bf16.msra.mxu0 %v851_v3  ;;  %819 = vmatpush3.bf16.msra.mxu1 %v851_v3  ;;  %v744_v17 = vunpack.c.l.bf16 %v768_v13  ;;  %v740_v20 = vunpack.c.l.bf16 %v767_v15  ;;  %v745_v22 = vunpack.c.h.bf16 %v768_v13  ;;  %v741_v25 = vunpack.c.h.bf16 %v767_v15 }
  0x15   : > { %792 = vmatprep.subr.bf16.mxu0 %v852_v6  ;;  %812 = vmatprep.subr.bf16.mxu1 %v852_v6  ;;  %v508_v26 = vmul.f32 %v736_v16, %v708_v18  ;;  %v506_v30 = vmul.f32 %v732_v19, %v708_v18  ;;  %v509_v36 = vmul.f32 %v737_v21, %v708_v18 }
  0x16   : > { %v512_v27 = vmul.f32 %v744_v17, %v708_v18  ;;  %v510_v31 = vmul.f32 %v740_v20, %v708_v18  ;;  %v513_v37 = vmul.f32 %v745_v22, %v708_v18  ;;  %v507_v42 = vmul.f32 %v733_v24, %v708_v18 }
  0x17   : > { %v511_v43 = vmul.f32 %v741_v25, %v708_v18 }
  0x18   : > { %793 = vmatpush3.bf16.msra.mxu0 %v852_v6  ;;  %820 = vmatpush3.bf16.msra.mxu1 %v852_v6 }
  0x19   : > { %794 = vmatprep.subr.bf16.mxu0 %v853_v7  ;;  %813 = vmatprep.subr.bf16.mxu1 %v853_v7 }
  0x1c   : > { %795 = vmatpush3.bf16.msra.mxu0 %v853_v7  ;;  %821 = vmatpush3.bf16.msra.mxu1 %v853_v7 }
  0x1d   : > { %796 = vmatprep.subr.bf16.mxu0 %v854_v8  ;;  %814 = vmatprep.subr.bf16.mxu1 %v854_v8 }
  0x20   : > { %797 = vmatpush3.bf16.msra.mxu0 %v854_v8  ;;  %822 = vmatpush3.bf16.msra.mxu1 %v854_v8 }
  0x21   : > { %798 = vmatprep.subr.bf16.mxu0 %v855_v9  ;;  %815 = vmatprep.subr.bf16.mxu1 %v855_v9 }
  0x24   : > { %799 = vmatpush3.bf16.msra.mxu0 %v855_v9  ;;  %823 = vmatpush3.bf16.msra.mxu1 %v855_v9 }
  0x27   : > { %801 = vmatmul.mubr.bf16.vlgmr.msra.gmra.mrb[0].mxu0 %v858_v10  ;;  %805 = vmatmul.mubr.bf16.vlgmr.msra.gmra.mrb[0].mxu1 %v859_v11 }
  0xfa   : > { %v802_v28 = vpop.f32.mrb[0].mxu0  ;;  %v806_v29 = vpop.f32.mrb[0].mxu1 }
  0xfb   : > { %v461_v32 = vadd.f32 %v802_v28, %v695_v23  ;;  %v477_v33 = vadd.f32 %v806_v29, %v695_v23  ;;  %v452_v34 = vpop.f32.mrb[1].mxu0  ;;  %v468_v35 = vpop.f32.mrb[1].mxu1 }
  0xfc   : > { %v453_v38 = vadd.f32 %v695_v23, %v452_v34  ;;  %v469_v39 = vadd.f32 %v695_v23, %v468_v35  ;;  %v803_v40 = vpop.f32.mrb[2].mxu0  ;;  %v807_v41 = vpop.f32.mrb[2].mxu1 }
  0xfd   : > { %v516_v44 = vadd.f32 %v508_v26, %v461_v32  ;;  %v520_v45 = vadd.f32 %v512_v27, %v477_v33  ;;  %v464_v46 = vadd.f32 %v803_v40, %v695_v23  ;;  %v480_v47 = vadd.f32 %v807_v41, %v695_v23  ;;  %v455_v48 = vpop.f32.mrb[3].mxu0  ;;  %v471_v49 = vpop.f32.mrb[3].mxu1 }
  0xfe   : > { %v514_v50 = vadd.f32 %v506_v30, %v453_v38  ;;  %v518_v51 = vadd.f32 %v510_v31, %v469_v39  ;;  %v456_v52 = vadd.f32 %v695_v23, %v455_v48  ;;  %v472_v53 = vadd.f32 %v695_v23, %v471_v49 }
  0xff   : > { %v517_v54 = vadd.f32 %v509_v36, %v464_v46  ;;  %v521_v55 = vadd.f32 %v513_v37, %v480_v47  ;;  %v524_v58 = vmax.f32 %v516_v44, 0.0  ;;  %v528_v59 = vmax.f32 %v520_v45, 0.0 }
 0x100   : > { %v515_v56 = vadd.f32 %v507_v42, %v456_v52  ;;  %v519_v57 = vadd.f32 %v511_v43, %v472_v53  ;;  %v522_v62 = vmax.f32 %v514_v50, 0.0  ;;  %v526_v63 = vmax.f32 %v518_v51, 0.0 }
 0x101   : > { %v525_v60 = vmax.f32 %v517_v54, 0.0  ;;  %v529_v61 = vmax.f32 %v521_v55, 0.0 }
 0x102   : > { %v523_v0 = vmax.f32 %v515_v56, 0.0  ;;  %v527_v1 = vmax.f32 %v519_v57, 0.0 }
 0x103   : > { %v754_v2 = vpack.c.bf16 %v525_v60, %v524_v58  ;;  %v764_v3 = vpack.c.bf16 %v529_v61, %v528_v59 }
 0x104   : > { %v749_v4 = vpack.c.bf16 %v523_v0, %v522_v62  ;;  %v759_v5 = vpack.c.bf16 %v527_v1, %v526_v63 }
 0x105   : > { %769 = vst [vmem:[%s312_s6 + $0x8] sm:$0xff] %v754_v2   ;;  %771 = vst [vmem:[%s312_s6 + $0x18] sm:$0xff] %v764_v3  }
 0x106   : > { %750 = vst [vmem:[%s312_s6] sm:$0xff] %v749_v4   ;;  %770 = vst [vmem:[%s312_s6 + $0x10] sm:$0xff] %v759_v5  }
 0x107 PF: > { %s15_s20 = sadd.s32 1, %s882_s20   ;;  %s1001_s18 = smov %s878_s19 }
 0x108   : > { %p12_p5 = scmp.ge.s32.totalorder %s15_s20, 4   ;;  %s1002_s19 = smov %s1004_s21 }
 0x10a   :  { %14 = sbr.rel (!%p12_p5) target bundleno = 2 (0x2), region = 76 }

</bundles_post_ra>
